<compile_context>
chip_gen: v6e
topology: v6e:2x2x1
jax: 0.10.0
libtpu: 0.0.40
codegen_flags: <defaults>
</compile_context>

<pallas_src>
import jax
import jax.numpy as jnp
from jax import lax
from jax.experimental import pallas as pl
from jax.experimental.pallas import tpu as pltpu


def _round_up(v, m):
    return ((v + m - 1) // m) * m


def _cdiv(a, b):
    return (a + b - 1) // b


def _pick_tile(padded, max_tile, align):
    """Largest multiple of `align` that divides `padded` and is <= max_tile."""
    t = min(max_tile, padded)
    t = max((t // align) * align, align)
    while padded % t != 0:
        t -= align
    return t


def _vmem_caps():
    """(soft_target, hard_limit) VMEM bytes for the current TPU generation."""
    try:
        cap = int(getattr(pltpu.get_tpu_info(), "vmem_capacity_bytes", 0)) or (128 << 20)
    except Exception:  # non-TPU / interpret fallback
        cap = 128 << 20
    if cap <= (64 << 20):
        # v7x-class: 64 MiB physical VMEM -> leave compiler-internal headroom.
        return cap - (14 << 20), cap - (6 << 20)
    # v5e / v6e: 128 MiB physical -> use far more than the 16/32 MiB scoped default.
    return min(cap - (28 << 20), 100 << 20), min(cap - (16 << 20), 112 << 20)


def _vmem_estimate(C, tn, th, n_chunks, x_bytes, out_bytes, w_bytes):
    """Honest VMEM estimate: double-buffered blocks + in-kernel temporaries."""
    c8 = _round_up(C, 8)          # f32 sublane padding
    c16 = _round_up(C, 16)        # bf16 sublane padding (W2 rows)
    c_lane = _round_up(C, 128)    # lane padding (W1 last dim)
    est = 0
    est += 2 * c8 * tn * x_bytes                  # x tile (double-buffered)
    est += 2 * c8 * tn * out_bytes                # out tile
    est += 2 * n_chunks * th * c_lane * w_bytes   # W1 blocks (TH, C)
    est += 2 * n_chunks * c16 * th * w_bytes      # W2 blocks (C, TH)
    est += 2 * n_chunks * th * 128 * 4            # b1 (TH, 1) -> lane-padded
    est += 2 * c8 * 128 * 4                       # b2 (C, 1)  -> lane-padded
    est += c8 * tn * w_bytes                      # x cast to bf16
    est += th * tn * (4 + w_bytes)                # h (f32) + bf16 copy of h
    est += c8 * tn * 4                            # f32 accumulator value
    return est


def ffn_kernel(x_ref, w1_ref, b1_ref, w2_ref, b2_ref, o_ref):
    # x_ref : (1, C, TN)         input tile (original dtype; cast to bf16 here)
    # w1_ref: (n_chunks, TH, C)  resident fc1 weight blocks (bf16)
    # b1_ref: (n_chunks, TH, 1)  resident fc1 bias blocks (f32)
    # w2_ref: (n_chunks, C, TH)  resident fc2 weight blocks (bf16)
    # b2_ref: (C, 1)             resident fc2 bias (f32)
    # o_ref : (1, C, TN)         output tile
    n_chunks = w1_ref.shape[0]
    x = x_ref[0].astype(w1_ref.dtype)                                   # (C, TN)

    def chunk(i):
        h = jnp.dot(w1_ref[i], x, preferred_element_type=jnp.float32)   # (TH, TN)
        h = jnp.maximum(h + b1_ref[i], 0.0)                             # bias + ReLU
        return jnp.dot(w2_ref[i], h.astype(w2_ref.dtype),
                       preferred_element_type=jnp.float32)              # (C, TN)

    acc = chunk(0)                                  # direct write, no zero-init RMW
    if n_chunks > 1:
        acc = lax.fori_loop(1, n_chunks, lambda i, a: a + chunk(i), acc,
                            unroll=n_chunks <= 8)

    o_ref[0] = (acc + b2_ref[...]).astype(o_ref.dtype)


def feed_forward(x, w1, b1, w2, b2, *, tile_n=1024, tile_h=2048,
                 compute_dtype=jnp.bfloat16):
    """x: (B, C, N).  w1: (H, C), b1: (H,), w2: (C, H), b2: (C,)  (PyTorch layout).

    Returns (B, C, N), matching FeedForward.forward.
    """
    B, C, N = x.shape
    H, Cw = w1.shape
    assert Cw == C and w2.shape == (C, H) and b1.shape == (H,) and b2.shape == (C,)

    out_dtype = x.dtype
    x_bytes = jnp.dtype(x.dtype).itemsize
    out_bytes = jnp.dtype(out_dtype).itemsize
    w_bytes = jnp.dtype(compute_dtype).itemsize

    # --- tile selection: 256-aligned for the 256x256 MXUs (v6e/v7x), 128 floor --
    n_ceil = _round_up(N, 128)
    tn = min(_round_up(tile_n, 128), n_ceil)
    if tn >= 256:
        tn = (tn // 256) * 256
    if B == 1 and N > 128 and _cdiv(N, tn) < 2:
        # Guarantee >= 2 parallel tiles so both v7x TensorCores get work.
        tn = max(_round_up(_cdiv(N, 2), 128), 128)

    h_align = 256 if H >= 256 else 128
    h_pad = _round_up(H, h_align)
    th = _pick_tile(h_pad, max(_round_up(tile_h, h_align), h_align), h_align)

    # --- shrink tiles (th first, then tn) until the honest estimate fits -------
    soft_cap, hard_cap = _vmem_caps()
    while True:
        n_chunks = h_pad // th
        est = _vmem_estimate(C, tn, th, n_chunks, x_bytes, out_bytes, w_bytes)
        if est <= soft_cap:
            break
        if th > h_align:
            th = _pick_tile(h_pad, th // 2, h_align)
        elif tn > 128:
            tn = max(((tn // 2) // 128) * 128, 128)
        else:
            # TODO(synk): fall back to streaming W1/W2 over a hidden grid axis
            # when the resident-weight footprint alone exceeds the VMEM budget.
            break
    n_chunks = h_pad // th
    vmem_limit = int(min(hard_cap, max(est + (16 << 20), 32 << 20)))

    # --- one-time weight prep: zero-pad H, cast to bf16, pre-block per chunk ---
    # relu(0*x + 0) = 0 and the padded fc2 columns are 0, so padding is exact.
    if h_pad != H:
        w1 = jnp.pad(w1, ((0, h_pad - H), (0, 0)))
        b1 = jnp.pad(b1, ((0, h_pad - H),))
        w2 = jnp.pad(w2, ((0, 0), (0, h_pad - H)))
    w1_blk = w1.astype(compute_dtype).reshape(n_chunks, th, C)
    b1_blk = b1.astype(jnp.float32).reshape(n_chunks, th, 1)
    w2_blk = w2.astype(compute_dtype).reshape(C, n_chunks, th).transpose(1, 0, 2)
    b2_2d = b2.astype(jnp.float32).reshape(C, 1)

    # Ragged N edge handled by the cdiv grid (Pallas masks OOB reads/writes,
    # and every lane/column is independent through both matmuls).
    grid = (B, _cdiv(N, tn))

    return pl.pallas_call(
        ffn_kernel,
        out_shape=jax.ShapeDtypeStruct((B, C, N), out_dtype),
        grid=grid,
        in_specs=[
            pl.BlockSpec((1, C, tn), lambda b, j: (b, 0, j)),          # x tile
            pl.BlockSpec((n_chunks, th, C), lambda b, j: (0, 0, 0)),   # W1 (resident)
            pl.BlockSpec((n_chunks, th, 1), lambda b, j: (0, 0, 0)),   # b1 (resident)
            pl.BlockSpec((n_chunks, C, th), lambda b, j: (0, 0, 0)),   # W2 (resident)
            pl.BlockSpec((C, 1), lambda b, j: (0, 0)),                 # b2 (resident)
        ],
        out_specs=pl.BlockSpec((1, C, tn), lambda b, j: (b, 0, j)),
        compiler_params=pltpu.CompilerParams(
            dimension_semantics=("parallel", "parallel"),
            vmem_limit_bytes=vmem_limit,
        ),
    )(x, w1_blk, b1_blk, w2_blk, b2_2d)


def feed_forward_ref(x, w1, b1, w2, b2):
    """Pure-JAX f32 reference mirroring the PyTorch forward exactly."""
    xt = jnp.transpose(x, (0, 2, 1))                  # (B, N, C)
    h = jnp.maximum(xt @ w1.T + b1, 0.0)              # fc1 + relu
    y = h @ w2.T + b2                                 # fc2
    return jnp.transpose(y, (0, 2, 1))                # (B, C, N)


if __name__ == "__main__":
    # Small, module-consistent shapes: x is (batch, feat_size, seq_len).
    #   SEQ=200 (non-multiple of 128) -> exercises the ragged-lane edge masking.
    #   HIDDEN=192 with tile_h=128    -> exercises hidden zero-padding and the
    #                                    in-kernel multi-chunk fori_loop.
    #   tile_n=128                    -> exercises multiple N tiles per batch.
    B, FEAT, SEQ, HIDDEN = 2, 16, 200, 192

    key = jax.random.PRNGKey(0)
    kx, kw1, kb1, kw2, kb2 = jax.random.split(key, 5)

    x = jax.random.normal(kx, (B, FEAT, SEQ), dtype=jnp.float32)

    # Deterministic parameter init (Kaiming-uniform-ish bounds, PyTorch (out, in) layout).
    bound1 = 1.0 / (FEAT ** 0.5)
    bound2 = 1.0 / (HIDDEN ** 0.5)
    w1 = jax.random.uniform(kw1, (HIDDEN, FEAT), jnp.float32, -bound1, bound1)
    b1 = jax.random.uniform(kb1, (HIDDEN,), jnp.float32, -bound1, bound1)
    w2 = jax.random.uniform(kw2, (FEAT, HIDDEN), jnp.float32, -bound2, bound2)
    b2 = jax.random.uniform(kb2, (FEAT,), jnp.float32, -bound2, bound2)

    out = feed_forward(x, w1, b1, w2, b2, tile_n=128, tile_h=128)
    out = jax.block_until_ready(out)

    ref = feed_forward_ref(x, w1, b1, w2, b2)
    assert out.shape == (B, FEAT, SEQ), out.shape
    # bf16 MXU operands with f32 accumulation -> modest tolerance vs f32 reference.
    assert jnp.allclose(out, ref, atol=3e-2, rtol=3e-2), "mismatch vs reference"

    print("KERNEL_OK")
</pallas_src>

<mosaic_0001>
module attributes {stable_mosaic.version = 11 : i64} {
  func.func @ffn_kernel(%arg0: i32, %arg1: i32, %arg2: memref<1x16x128xf32, #tpu.memory_space<vmem>>, %arg3: memref<2x128x16xbf16, #tpu.memory_space<vmem>>, %arg4: memref<2x128x1xf32, #tpu.memory_space<vmem>>, %arg5: memref<2x16x128xbf16, #tpu.memory_space<vmem>>, %arg6: memref<16x1xf32, #tpu.memory_space<vmem>>, %arg7: memref<1x16x128xf32, #tpu.memory_space<vmem>>) attributes {dimension_semantics = [#tpu.dimension_semantics<parallel>, #tpu.dimension_semantics<parallel>], iteration_bounds = array<i64: 2, 2>, scalar_prefetch = 0 : i64, scratch_operands = 0 : i64, tpu.core_type = #tpu.core_type<tc>, window_params = [{transform_indices = @transform_0, window_bounds = array<i64: 1, 16, 128>}, {pipeline_mode = #tpu.pipeline_mode<synchronous>, transform_indices = @transform_1, window_bounds = array<i64: 2, 128, 16>}, {pipeline_mode = #tpu.pipeline_mode<synchronous>, transform_indices = @transform_2, window_bounds = array<i64: 2, 128, 1>}, {pipeline_mode = #tpu.pipeline_mode<synchronous>, transform_indices = @transform_3, window_bounds = array<i64: 2, 16, 128>}, {pipeline_mode = #tpu.pipeline_mode<synchronous>, transform_indices = @transform_4, window_bounds = array<i64: 16, 1>}, {transform_indices = @transform_5, window_bounds = array<i64: 1, 16, 128>}]} {
    %c0 = arith.constant 0 : index
    %c0_0 = arith.constant 0 : index
    %c0_1 = arith.constant 0 : index
    %0 = vector.load %arg2[%c0, %c0_0, %c0_1] : memref<1x16x128xf32, #tpu.memory_space<vmem>>, vector<1x16x128xf32>
    %1 = vector.shape_cast %0 : vector<1x16x128xf32> to vector<16x128xf32>
    %2 = arith.truncf %1 : vector<16x128xf32> to vector<16x128xbf16>
    %c0_2 = arith.constant 0 : index
    %c0_3 = arith.constant 0 : index
    %c0_4 = arith.constant 0 : index
    %3 = vector.load %arg3[%c0_2, %c0_3, %c0_4] : memref<2x128x16xbf16, #tpu.memory_space<vmem>>, vector<1x128x16xbf16>
    %4 = vector.shape_cast %3 : vector<1x128x16xbf16> to vector<128x16xbf16>
    %cst = arith.constant dense<0.000000e+00> : vector<128x128xf32>
    %5 = tpu.matmul %4, %2, %cst {dimension_numbers = #tpu.dot_dimension_numbers<[1], [0], [0], [1], [0, 0, 1, 1], [], []>} : vector<128x16xbf16>, vector<16x128xbf16>, vector<128x128xf32> -> vector<128x128xf32>
    %c0_5 = arith.constant 0 : index
    %c0_6 = arith.constant 0 : index
    %c0_7 = arith.constant 0 : index
    %6 = vector.load %arg4[%c0_5, %c0_6, %c0_7] : memref<2x128x1xf32, #tpu.memory_space<vmem>>, vector<1x128x1xf32>
    %7 = vector.shape_cast %6 : vector<1x128x1xf32> to vector<128x1xf32>
    %8 = vector.broadcast %7 : vector<128x1xf32> to vector<128x128xf32>
    %9 = arith.addf %5, %8 : vector<128x128xf32>
    %cst_8 = arith.constant 0.000000e+00 : f32
    %10 = vector.broadcast %cst_8 : f32 to vector<128x128xf32>
    %11 = arith.maximumf %9, %10 : vector<128x128xf32>
    %c0_9 = arith.constant 0 : index
    %c0_10 = arith.constant 0 : index
    %c0_11 = arith.constant 0 : index
    %12 = vector.load %arg5[%c0_9, %c0_10, %c0_11] : memref<2x16x128xbf16, #tpu.memory_space<vmem>>, vector<1x16x128xbf16>
    %13 = vector.shape_cast %12 : vector<1x16x128xbf16> to vector<16x128xbf16>
    %14 = arith.truncf %11 : vector<128x128xf32> to vector<128x128xbf16>
    %cst_12 = arith.constant dense<0.000000e+00> : vector<16x128xf32>
    %15 = tpu.matmul %13, %14, %cst_12 {dimension_numbers = #tpu.dot_dimension_numbers<[1], [0], [0], [1], [0, 0, 1, 1], [], []>} : vector<16x128xbf16>, vector<128x128xbf16>, vector<16x128xf32> -> vector<16x128xf32>
    %c1_i32 = arith.constant 1 : i32
    %16 = arith.index_cast %c1_i32 : i32 to index
    %c0_13 = arith.constant 0 : index
    %c0_14 = arith.constant 0 : index
    %17 = vector.load %arg3[%16, %c0_13, %c0_14] : memref<2x128x16xbf16, #tpu.memory_space<vmem>>, vector<1x128x16xbf16>
    %18 = vector.shape_cast %17 : vector<1x128x16xbf16> to vector<128x16xbf16>
    %cst_15 = arith.constant dense<0.000000e+00> : vector<128x128xf32>
    %19 = tpu.matmul %18, %2, %cst_15 {dimension_numbers = #tpu.dot_dimension_numbers<[1], [0], [0], [1], [0, 0, 1, 1], [], []>} : vector<128x16xbf16>, vector<16x128xbf16>, vector<128x128xf32> -> vector<128x128xf32>
    %20 = arith.index_cast %c1_i32 : i32 to index
    %c0_16 = arith.constant 0 : index
    %c0_17 = arith.constant 0 : index
    %21 = vector.load %arg4[%20, %c0_16, %c0_17] : memref<2x128x1xf32, #tpu.memory_space<vmem>>, vector<1x128x1xf32>
    %22 = vector.shape_cast %21 : vector<1x128x1xf32> to vector<128x1xf32>
    %23 = vector.broadcast %22 : vector<128x1xf32> to vector<128x128xf32>
    %24 = arith.addf %19, %23 : vector<128x128xf32>
    %cst_18 = arith.constant 0.000000e+00 : f32
    %25 = vector.broadcast %cst_18 : f32 to vector<128x128xf32>
    %26 = arith.maximumf %24, %25 : vector<128x128xf32>
    %27 = arith.index_cast %c1_i32 : i32 to index
    %c0_19 = arith.constant 0 : index
    %c0_20 = arith.constant 0 : index
    %28 = vector.load %arg5[%27, %c0_19, %c0_20] : memref<2x16x128xbf16, #tpu.memory_space<vmem>>, vector<1x16x128xbf16>
    %29 = vector.shape_cast %28 : vector<1x16x128xbf16> to vector<16x128xbf16>
    %30 = arith.truncf %26 : vector<128x128xf32> to vector<128x128xbf16>
    %cst_21 = arith.constant dense<0.000000e+00> : vector<16x128xf32>
    %31 = tpu.matmul %29, %30, %cst_21 {dimension_numbers = #tpu.dot_dimension_numbers<[1], [0], [0], [1], [0, 0, 1, 1], [], []>} : vector<16x128xbf16>, vector<128x128xbf16>, vector<16x128xf32> -> vector<16x128xf32>
    %32 = arith.addf %15, %31 : vector<16x128xf32>
    %c1_i32_22 = arith.constant 1 : i32
    %c0_23 = arith.constant 0 : index
    %c0_24 = arith.constant 0 : index
    %33 = vector.load %arg6[%c0_23, %c0_24] : memref<16x1xf32, #tpu.memory_space<vmem>>, vector<16x1xf32>
    %34 = vector.broadcast %33 : vector<16x1xf32> to vector<16x128xf32>
    %35 = arith.addf %32, %34 : vector<16x128xf32>
    %c0_25 = arith.constant 0 : index
    %c0_26 = arith.constant 0 : index
    %c0_27 = arith.constant 0 : index
    %36 = vector.load %arg7[%c0_25, %c0_26, %c0_27] : memref<1x16x128xf32, #tpu.memory_space<vmem>>, vector<1x16x128xf32>
    %37 = vector.shape_cast %36 : vector<1x16x128xf32> to vector<16x128xf32>
    %38 = vector.shape_cast %35 : vector<16x128xf32> to vector<1x16x128xf32>
    tpu.vector_store %arg7[%c0_25, %c0_26, %c0_27], %38 {strides = array<i32>} : memref<1x16x128xf32, #tpu.memory_space<vmem>>, vector<1x16x128xf32>,
    return
  }
  func.func @transform_0(%arg0: i32, %arg1: i32) -> (i32, i32, i32) {
    %c0_i32 = arith.constant 0 : i32
    %c0_i32_0 = arith.constant 0 : i32
    return %arg0, %c0_i32, %arg1 : i32, i32, i32
  }
  func.func @transform_1(%arg0: i32, %arg1: i32) -> (i32, i32, i32) {
    %c0_i32 = arith.constant 0 : i32
    %c0_i32_0 = arith.constant 0 : i32
    %c0_i32_1 = arith.constant 0 : i32
    %c0_i32_2 = arith.constant 0 : i32
    return %c0_i32, %c0_i32_0, %c0_i32_1 : i32, i32, i32
  }
  func.func @transform_2(%arg0: i32, %arg1: i32) -> (i32, i32, i32) {
    %c0_i32 = arith.constant 0 : i32
    %c0_i32_0 = arith.constant 0 : i32
    %c0_i32_1 = arith.constant 0 : i32
    %c0_i32_2 = arith.constant 0 : i32
    return %c0_i32, %c0_i32_0, %c0_i32_1 : i32, i32, i32
  }
  func.func @transform_3(%arg0: i32, %arg1: i32) -> (i32, i32, i32) {
    %c0_i32 = arith.constant 0 : i32
    %c0_i32_0 = arith.constant 0 : i32
    %c0_i32_1 = arith.constant 0 : i32
    %c0_i32_2 = arith.constant 0 : i32
    return %c0_i32, %c0_i32_0, %c0_i32_1 : i32, i32, i32
  }
  func.func @transform_4(%arg0: i32, %arg1: i32) -> (i32, i32) {
    %c0_i32 = arith.constant 0 : i32
    %c0_i32_0 = arith.constant 0 : i32
    %c0_i32_1 = arith.constant 0 : i32
    return %c0_i32, %c0_i32_0 : i32, i32
  }
  func.func @transform_5(%arg0: i32, %arg1: i32) -> (i32, i32, i32) {
    %c0_i32 = arith.constant 0 : i32
    %c0_i32_0 = arith.constant 0 : i32
    return %arg0, %c0_i32, %arg1 : i32, i32, i32
  }
}

</mosaic_0001>

<bundles_post_ra>
// kernel: tpu_custom_call.1
= control target key start
LH: loop header
LB: loop body
LE: loop exit
PB: predicated region body
PF: predicated region fallthrough
CT: control target
= control target key end

     0   :  { %s1951_s0 = inlined_call_operand.vmem [shape: f32[2,16,200], index: 0, kind: input, shape index: {}]   ;;  %s1952_s1 = inlined_call_operand.vmem [shape: bf16[2,128,16], index: 1, kind: input, shape index: {}]   ;;  %s1953_s2 = inlined_call_operand.vmem [shape: f32[2,128,1], index: 2, kind: input, shape index: {}]   ;;  %s1954_s3 = inlined_call_operand.vmem [shape: bf16[2,16,128], index: 3, kind: input, shape index: {}]   ;;  %s1955_s4 = inlined_call_operand.vmem [shape: f32[16,1], index: 4, kind: input, shape index: {}]   ;;  %s1956_s5 = inlined_call_operand.hbm [shape: f32[2,16,200], index: 5, kind: output, shape index: {}]  }
   0x1   :  { %1960 = sst [smem:[#allocation13_spill]] %s1951_s0 }
   0x2   :  { %10 = vsyncpa [#allocation4], 0 }
   0x3   :  { %12 = vsyncpa [#allocation4 + $0x1], 0  ;;  %s1517_s18 = smov 0   ;;  %s1519_s19 = smov 0  }
   0x4   :  { %s1521_s20 = smov 0   ;;  %s1523_s21 = smov 0  }
   0x5   :  { %s1525_s22 = smov 0   ;;  %s1527_s23 = smov 0  }
   0x6   :  { %s1529_s24 = smov 0   ;;  %s1531_s25 = smov 0  }
   0x7 LB: > { %s1094_s26 = sadd.s32 4294967295, %s1478_s25   ;;  %s1095_s27 = sadd.s32 4294967294, %s1478_s25   ;;  %s1478_s25 = sphi %s1531_s25, %s18_s25   ;;  %s1474_s24 = sphi %s1529_s24, %s1987_s24   ;;  %s1470_s23 = sphi %s1527_s23, %s1986_s23   ;;  %s1466_s22 = sphi %s1525_s22, %s1985_s22   ;;  %s1462_s21 = sphi %s1523_s21, %s1984_s21   ;;  %s1458_s20 = sphi %s1521_s20, %s1983_s20   ;;  %s1454_s19 = sphi %s1519_s19, %s1982_s19   ;;  %s1450_s18 = sphi %s1517_s18, %s1981_s18  }
   0x8   : > { %s27_s28 = sadd.s32 1, %s1470_s23  ;;  %s30_s29 = sadd.s32 1, %s1474_s24 }
   0x9   : > { %p28_p0 = scmp.ge.s32.totalorder %s27_s28, 2  ;;  %p46_p1 = scmp.ne.s32.totalorder %s1458_s20, %s1454_s19 }
   0xa   : > { %p47_p2 = scmp.eq.s32.totalorder %s1478_s25, 0  ;;  %p162_p5 = scmp.eq.s32.totalorder %s1094_s26, 3 }
   0xb   : > { %s1989_s28 = smov (%p28_p0, %s27_s28), 0  ;;  %s1991_s29 = smov (!%p28_p0, %s30_s29), %s1474_s24 }
   0xc   : > { %s35_s30 = ssub.s32 %s1470_s23, %s1989_s28  ;;  %p1569_p3 = por %p47_p2, %p46_p1 }
   0xd   : > { %p32_p4 = scmp.ge.s32.totalorder %s1991_s29, 2  ;;  %p167_p6 = scmp.ne.s32.totalorder %s1454_s19, %s1450_s18 }
   0xe   : > { %p168_p7 = scmp.eq.s32.totalorder %s1095_s27, 3  ;;  %p1577_p8 = por %p162_p5, %p46_p1 }
   0xf   : > { %s1993_s29 = smov (%p32_p4, %s1991_s29), 0  ;;  %s39_s11 = sadd.s32 1, %s1458_s20 }
  0x10   : > { %p1581_p9 = por %p168_p7, %p167_p6  ;;  %s34_s9 = ssub.s32 %s1474_s24, %s1993_s29 }
  0x11   : > { %s36_s10 = sor.u32 %s35_s30, %s34_s9  ;;  %p1097_p11 = scmp.ge.s32.totalorder %s1478_s25, 4 }
  0x12   : > { %p37_p10 = scmp.eq.s32.totalorder %s36_s10, 0 }
  0x13   : > { %196 = sbr.rel (%p1097_p11) target bundleno = 35 (0x23), region = 32 }
  0x14   : > { %s1589_s12 = scalar_select %p37_p10, %s1458_s20, %s39_s11  }
  0x18   : > { %199 = sbr.rel (!%p1569_p3) target bundleno = 35 (0x23), region = 36  ;;  %s201_s13 = sand.u32 (%p1569_p3), 1, %s1458_s20  }
  0x19   : > { %s1099_s14 = sshll.u32 (%p1569_p3), %s1474_s24, 2  ;;  %s1098_s15 = sshll.u32 (%p1569_p3), %s201_s13, 4 }
  0x1a   : > { %s205_s16 = sadd.s32 (%p1569_p3), %s1470_s23, %s1099_s14  ;;  %s1964_s0 = sld [smem:[#allocation13_spill]] (%p1569_p3) }
  0x1b   : > { %s1100_s17 = sshll.u32 (%p1569_p3), %s205_s16, 3  ;;  %s203_s9 = scalar_lea.vmem (%p1569_p3), [#allocation2], %s1098_s15 }
  0x20   : > { %s207_s30 = scalar_lea.vmem %s1964_s0, %s1100_s17 }
  0x21   : > { %v238_v0 = vld [vmem:[%s207_s30] sm:$0xff]  ;;  %v240_v1 = vld [vmem:[%s207_s30 + $0x10] sm:$0xff] }
  0x22   : > { %239 = vst [vmem:[%s203_s9] sm:$0xff] %v238_v0  ;;  %241 = vst [vmem:[%s203_s9 + $0x8] sm:$0xff] %v240_v1 }
  0x23 PF: > { %p1101_p12 = scmp.ge.s32.totalorder %s1478_s25, 1  ;;  %p246_p13 = scmp.lt.s32.totalorder %s1478_s25, 5 }
  0x25   : > { %p247_p0 = pnand %p1101_p12, %p246_p13 }
  0x27   : > { %250 = sbr.rel (%p247_p0) target bundleno = 528 (0x210), region = 74 }
  0x2c   : > { %s1957_s6 = sand.u32 1, %s1454_s19   ;;  %v1368_v2 = vld [vmem:[%s1952_s1] sm:$0xff]   ;;  %vm436_vm0 = vcmask 130048   ;;  %v1480_v6 = vmov 0   ;;  %v1150_v8 = vld [vmem:[%s1953_s2 + $0xf0] sm:$0xff]  ;;  %v1370_v10 = vld [vmem:[%s1952_s1 + $0x8] sm:$0xff]  }
  0x2d   : > { %s1608_s13 = sshll.u32 %s1957_s6, 4  ;;  %v1369_v3 = vld [vmem:[%s1952_s1 + $0x40] sm:$0xff]   ;;  %1215 = vmatprep.mubr.msk.bf16.mxu0 %vm436_vm0, %v1368_v2  ;;  %1367 = vset.pattern.permute.xlu1 %v1480_v6  ;;  %v314_v9 = vld [vmem:[%s1953_s2 + $0x70] sm:$0xff]  ;;  %v1371_v11 = vld [vmem:[%s1952_s1 + $0x48] sm:$0xff]   ;;  %v1958_v56 = vmov 0.0   ;;  %vm1482_vm1 = vmmov 0  }
  0x2e   : > { %s255_s16 = scalar_lea.vmem [#allocation2], %s1608_s13  ;;  %1233 = vmatprep.mubr.msk.bf16.mxu1 %vm436_vm0, %v1369_v3  ;;  %1366 = vset.pattern.permute.xlu0 %v1480_v6  ;;  %v1151_v12 = vld [vmem:[%s1953_s2 + $0xf8] sm:$0xff]  ;;  %v1372_v13 = vld [vmem:[%s1952_s1 + $0x10] sm:$0xff]   ;;  %v313_v18 = vld [vmem:[%s1953_s2 + $0x68] sm:$0xff]  ;;  %s1173_s11 = sshll.u32 %s1466_s22, 2 }
  0x2f   : > { %v281_v4 = vld [vmem:[%s255_s16] sm:$0xff]  ;;  %v282_v5 = vld [vmem:[%s255_s16 + $0x8] sm:$0xff]  ;;  %690 = vperm.xlu1 %1367, %v1150_v8   ;;  %388 = vperm.xlu0 %1366, %v314_v9   ;;  %s1008_s14 = sadd.s32 %s1462_s21, %s1173_s11  ;;  %s279_s15 = scalar_lea.vmem [#allocation3], %s1608_s13 }
  0x30   : > { %v283_v7 = vpack.c.bf16 %v282_v5, %v281_v4  ;;  %v1373_v14 = vld [vmem:[%s1952_s1 + $0x50] sm:$0xff]   ;;  %v315_v15 = vld [vmem:[%s1953_s2 + $0x78] sm:$0xff]  ;;  %v312_v19 = vld [vmem:[%s1953_s2 + $0x60] sm:$0xff]  ;;  %s1011_s16 = sshll.u32 %s279_s15, 4  ;;  %s1174_s0 = sshll.u32 %s1008_s14, 7  ;;  %s1891_s16 = int_to_ptr.vmem [resolvable:$true] %s1011_s16 }
  0x31   : > { %v1374_v16 = vld [vmem:[%s1952_s1 + $0x18] sm:$0xff]   ;;  %v1376_v20 = vld [vmem:[%s1952_s1 + $0x20] sm:$0xff]   ;;  %v1149_v22 = vld [vmem:[%s1953_s2 + $0xe8] sm:$0xff]  ;;  %s1896_s13 = scalar_lea.hbm %s1956_s5, %s1174_s0  ;;  %s1980_s6 = sand.u32 1, %s1454_s19  }
  0x32   : > { %1213 = vmatprep.subr.bf16.mxu0 %v283_v7  ;;  %1231 = vmatprep.subr.bf16.mxu1 %v283_v7  ;;  %v1375_v17 = vld [vmem:[%s1952_s1 + $0x58] sm:$0xff]   ;;  %v1377_v21 = vld [vmem:[%s1952_s1 + $0x60] sm:$0xff]   ;;  %v310_v25 = vld [vmem:[%s1953_s2 + $0x50] sm:$0xff]  ;;  %s1900_s17 = scalar_lea.sflag [#allocation4], %s1980_s6  ;;  %s1386_s26 = scalar_lea.vmem %s1891_s16, 256 }
  0x33   : > { %1214 = vmatpush3.bf16.msra.mxu0 %v283_v7  ;;  %1232 = vmatpush3.bf16.msra.mxu1 %v283_v7  ;;  %v1148_v23 = vld [vmem:[%s1953_s2 + $0xe0] sm:$0xff]  ;;  %v311_v24 = vld [vmem:[%s1953_s2 + $0x58] sm:$0xff]  ;;  %v1378_v26 = vld [vmem:[%s1952_s1 + $0x28] sm:$0xff]   ;;  %p1387_p1 = scmp.ne.s32.totalorder %s1891_s16, %s1386_s26  ;;  %s1483_s27 = smov [#allocation3]  }
  0x34   : > { %695 = vperm.xlu1 %1367, %v1151_v12   ;;  %393 = vperm.xlu0 %1366, %v315_v15   ;;  %v1379_v27 = vld [vmem:[%s1952_s1 + $0x68] sm:$0xff]   ;;  %v1380_v28 = vld [vmem:[%s1952_s1 + $0x30] sm:$0xff]   ;;  %v1147_v30 = vld [vmem:[%s1953_s2 + $0xd8] sm:$0xff]  ;;  %s1390_s30 = sshll.u32 %s1483_s27, 4  ;;  %s1391_s30 = int_to_ptr.vmem [resolvable:$false] %s1390_s30 }
  0x35   : > { %v1381_v29 = vld [vmem:[%s1952_s1 + $0x70] sm:$0xff]   ;;  %v309_v32 = vld [vmem:[%s1953_s2 + $0x48] sm:$0xff]  ;;  %v308_v33 = vld [vmem:[%s1953_s2 + $0x40] sm:$0xff]  ;;  %1249 = vmatprep.subr.bf16.mxu0 %v1958_v56  ;;  %1269 = vmatprep.subr.bf16.mxu1 %v1958_v56  ;;  %p1388_p2 = pnand %p1387_p1, %p1577_p8  ;;  %s1392_s9 = scalar_lea.vmem %s1391_s30, 512 }
  0x36   : > { %1216 = vmatmul.mubr.msk.bf16.vlgmr.msra.gmra.mxu0 %vm436_vm0, %v1370_v10  ;;  %1234 = vmatmul.mubr.msk.bf16.vlgmr.msra.gmra.mxu1 %vm436_vm0, %v1371_v11  ;;  %v1146_v31 = vld [vmem:[%s1953_s2 + $0xd0] sm:$0xff]  ;;  %v1382_v34 = vld [vmem:[%s1952_s1 + $0x38] sm:$0xff]   ;;  %v1145_v36 = vld [vmem:[%s1953_s2 + $0xc8] sm:$0xff]  ;;  %p1393_p4 = scmp.lt.s32.totalorder %s1891_s16, %s1391_s30  ;;  %p1394_p5 = scmp.lt.s32.totalorder %s1392_s9, %s1386_s26 }
  0x37   : > { %1219 = vmatprep.mubr.msk.bf16.mxu0 %vm436_vm0, %v1372_v13  ;;  %1237 = vmatprep.mubr.msk.bf16.mxu1 %vm436_vm0, %v1373_v14  ;;  %v1383_v35 = vld [vmem:[%s1952_s1 + $0x78] sm:$0xff]   ;;  %v1144_v37 = vld [vmem:[%s1953_s2 + $0xc0] sm:$0xff]  ;;  %v306_v39 = vld [vmem:[%s1953_s2 + $0x30] sm:$0xff]  ;;  %p1389_p3 = pneg %p1388_p2 }
  0x38   : > { %383 = vperm.xlu1 %1367, %v313_v18   ;;  %378 = vperm.xlu0 %1366, %v312_v19   ;;  %v307_v38 = vld [vmem:[%s1953_s2 + $0x38] sm:$0xff]  ;;  %v1142_v41 = vld [vmem:[%s1953_s2 + $0xb0] sm:$0xff]  ;;  %v305_v42 = vld [vmem:[%s1953_s2 + $0x28] sm:$0xff]  ;;  %p1395_p6 = por %p1394_p5, %p1393_p4 }
  0x39   : > { %v1143_v40 = vld [vmem:[%s1953_s2 + $0xb8] sm:$0xff]  ;;  %v304_v43 = vld [vmem:[%s1953_s2 + $0x20] sm:$0xff]  ;;  %v1141_v44 = vld [vmem:[%s1953_s2 + $0xa8] sm:$0xff] }
  0x3a   : > { %v1140_v45 = vld [vmem:[%s1953_s2 + $0xa0] sm:$0xff]  ;;  %v303_v46 = vld [vmem:[%s1953_s2 + $0x18] sm:$0xff]  ;;  %v302_v47 = vld [vmem:[%s1953_s2 + $0x10] sm:$0xff]  ;;  %p1396_p7 = pnand %p1395_p6, %p1389_p3 }
  0x3b   : > { %v1139_v48 = vld [vmem:[%s1953_s2 + $0x98] sm:$0xff]  ;;  %v1138_v49 = vld [vmem:[%s1953_s2 + $0x90] sm:$0xff]  ;;  %v301_v50 = vld [vmem:[%s1953_s2 + $0x8] sm:$0xff] }
  0x3c   : > { %685 = vperm.xlu1 %1367, %v1149_v22   ;;  %680 = vperm.xlu0 %1366, %v1148_v23   ;;  %v300_v51 = vld [vmem:[%s1953_s2] sm:$0xff]  ;;  %v1137_v52 = vld [vmem:[%s1953_s2 + $0x88] sm:$0xff] }
  0x3d   : > { %v1136_v53 = vld [vmem:[%s1953_s2 + $0x80] sm:$0xff]  ;;  %v981_v54 = vld [vmem:[%s1955_s4 + $0x8] sm:$0xff] }
  0x3e   : > { %1220 = vmatmul.mubr.msk.bf16.gmra.mxu0 %vm436_vm0, %v1374_v16  ;;  %1238 = vmatmul.mubr.msk.bf16.gmra.mxu1 %vm436_vm0, %v1375_v17  ;;  %v980_v55 = vld [vmem:[%s1955_s4] sm:$0xff] }
  0x3f   : > { %1223 = vmatprep.mubr.msk.bf16.mxu0 %vm436_vm0, %v1376_v20  ;;  %1241 = vmatprep.mubr.msk.bf16.mxu1 %vm436_vm0, %v1377_v21 }
  0x40   : > { %373 = vperm.xlu1 %1367, %v311_v24   ;;  %368 = vperm.xlu0 %1366, %v310_v25  }
  0x44   : > { %675 = vperm.xlu1 %1367, %v1147_v30   ;;  %670 = vperm.xlu0 %1366, %v1146_v31  }
  0x46   : > { %1224 = vmatmul.mubr.msk.bf16.gmra.mxu0 %vm436_vm0, %v1378_v26  ;;  %1242 = vmatmul.mubr.msk.bf16.gmra.mxu1 %vm436_vm0, %v1379_v27 }
  0x47   : > { %1227 = vmatprep.mubr.msk.bf16.mxu0 %vm436_vm0, %v1380_v28  ;;  %1245 = vmatprep.mubr.msk.bf16.mxu1 %vm436_vm0, %v1381_v29 }
  0x48   : > { %363 = vperm.xlu1 %1367, %v309_v32   ;;  %358 = vperm.xlu0 %1366, %v308_v33  }
  0x4c   : > { %665 = vperm.xlu1 %1367, %v1145_v36   ;;  %660 = vperm.xlu0 %1366, %v1144_v37  }
  0x4e   : > { %1228 = vmatmul.mubr.msk.bf16.gmra.mxu0 %vm436_vm0, %v1382_v34  ;;  %1246 = vmatmul.mubr.msk.bf16.gmra.mxu1 %vm436_vm0, %v1383_v35 }
  0x4f   : > { %1265 = vmatprep.mubr.msk.bf16.mxu0 %vm1482_vm1, %v1958_v56  ;;  %1285 = vmatprep.mubr.msk.bf16.mxu1 %vm1482_vm1, %v1958_v56 }
  0x50   : > { %353 = vperm.xlu1 %1367, %v307_v38   ;;  %348 = vperm.xlu0 %1366, %v306_v39  }
  0x54   : > { %655 = vperm.xlu1 %1367, %v1143_v40   ;;  %650 = vperm.xlu0 %1366, %v1142_v41  }
  0x58   : > { %343 = vperm.xlu1 %1367, %v305_v42   ;;  %338 = vperm.xlu0 %1366, %v304_v43  }
  0x5c   : > { %645 = vperm.xlu1 %1367, %v1141_v44   ;;  %640 = vperm.xlu0 %1366, %v1140_v45  }
  0x60   : > { %333 = vperm.xlu1 %1367, %v303_v46   ;;  %328 = vperm.xlu0 %1366, %v302_v47  }
  0x64   : > { %635 = vperm.xlu1 %1367, %v1139_v48   ;;  %630 = vperm.xlu0 %1366, %v1138_v49  }
  0x68   : > { %323 = vperm.xlu1 %1367, %v301_v50   ;;  %318 = vperm.xlu0 %1366, %v300_v51  }
  0x6c   : > { %625 = vperm.xlu1 %1367, %v1137_v52   ;;  %620 = vperm.xlu0 %1366, %v1136_v53  }
  0x70   : > { %989 = vperm.xlu1 %1367, %v981_v54   ;;  %984 = vperm.xlu0 %1366, %v980_v55  }
  0xaa   : > { %v691_v57 = vpop.permute.xlu1 %690  ;;  %v389_v58 = vpop.permute.xlu0 %388 }
  0xaf   : > { %v696_v59 = vpop.permute.xlu1 %695  ;;  %v394_v60 = vpop.permute.xlu0 %393 }
  0xb3   : > { %v384_v61 = vpop.permute.xlu1 %383  ;;  %v379_v62 = vpop.permute.xlu0 %378 }
  0xb7   : > { %v686_v63 = vpop.permute.xlu1 %685  ;;  %v681_v0 = vpop.permute.xlu0 %680 }
  0xbb   : > { %v374_v1 = vpop.permute.xlu1 %373  ;;  %v1778_v2 = vpop.permute.xlu0 %368 }
  0xbf   : > { %v676_v3 = vpop.permute.xlu1 %675  ;;  %v1780_v4 = vpop.permute.xlu0 %670 }
  0xc3   : > { %v1782_v5 = vpop.permute.xlu1 %363  ;;  %v1784_v6 = vpop.permute.xlu0 %358 }
  0xc7   : > { %v1794_v11 = vpop.permute.xlu1 %665  ;;  %v1800_v14 = vpop.permute.xlu0 %660 }
  0xcb   : > { %v1810_v19 = vpop.permute.xlu1 %353  ;;  %v1816_v22 = vpop.permute.xlu0 %348 }
  0xcf   : > { %v1826_v27 = vpop.permute.xlu1 %655  ;;  %v1828_v30 = vpop.permute.xlu0 %650 }
  0xd3   : > { %v1830_v35 = vpop.permute.xlu1 %343  ;;  %v1832_v38 = vpop.permute.xlu0 %338 }
  0xd7   : > { %v1834_v45 = vpop.permute.xlu1 %645  ;;  %v1836_v48 = vpop.permute.xlu0 %640 }
  0xf6   : > { %v1786_v7 = vpop.f32.mrf.mxu0  ;;  %v1788_v8 = vpop.f32.mrf.mxu1 }
  0xf7   : > { %1965 = vst [vmem:[#allocation6_spill] sm:$0xff] %v1786_v7  ;;  %1966 = vst [vmem:[#allocation7_spill] sm:$0xff] %v1788_v8 }
  0xf8   : > { %v1790_v9 = vpop.f32.mrf.mxu0  ;;  %v1792_v10 = vpop.f32.mrf.mxu1 }
  0xf9   : > { %1967 = vst [vmem:[#allocation8_spill] sm:$0xff] %v1790_v9  ;;  %1968 = vst [vmem:[#allocation9_spill] sm:$0xff] %v1792_v10 }
  0xfa   : > { %v1796_v12 = vpop.f32.mrf.mxu0  ;;  %v1798_v13 = vpop.f32.mrf.mxu1 }
  0xfb   : > { %1969 = vst [vmem:[#allocation10_spill] sm:$0xff] %v1798_v13  ;;  %v334_v13 = vpop.permute.xlu1 %333 }
  0xfc   : > { %v1802_v15 = vpop.f32.mrf.mxu0  ;;  %v1804_v16 = vpop.f32.mrf.mxu1 }
  0xfd   : > { %1970 = vst [vmem:[#allocation11_spill] sm:$0xff] %v1802_v15  ;;  %1971 = vst [vmem:[#allocation12_spill] sm:$0xff] %v1804_v16 }
  0xfe   : > { %v1806_v17 = vpop.f32.mrf.mxu0  ;;  %v1808_v18 = vpop.f32.mrf.mxu1 }
 0x100   : > { %v1812_v20 = vpop.f32.mrf.mxu0  ;;  %v1814_v21 = vpop.f32.mrf.mxu1 }
 0x102   : > { %v1818_v23 = vpop.f32.mrf.mxu0  ;;  %v1820_v24 = vpop.f32.mrf.mxu1 }
 0x104   : > { %v1822_v25 = vpop.f32.mrf.mxu0  ;;  %v1824_v26 = vpop.f32.mrf.mxu1 }
 0x106   : > { %v1225_v28 = vpop.f32.mrf.mxu0  ;;  %v1243_v29 = vpop.f32.mrf.mxu1 }
 0x108   : > { %v527_v31 = vpop.f32.mrf.mxu0  ;;  %v828_v32 = vpop.f32.mrf.mxu1 }
 0x10a   : > { %v1226_v33 = vpop.f32.mrf.mxu0  ;;  %v1244_v34 = vpop.f32.mrf.mxu1 }
 0x10c   : > { %v530_v36 = vpop.f32.mrf.mxu0  ;;  %v831_v37 = vpop.f32.mrf.mxu1 }
 0x10e   : > { %v1229_v39 = vpop.f32.mrf.mxu0  ;;  %v1247_v40 = vpop.f32.mrf.mxu1 }
 0x10f   : > { %v552_v41 = vadd.f32 %v1229_v39, %v389_v58  ;;  %v853_v42 = vadd.f32 %v1247_v40, %v691_v57  ;;  %v539_v39 = vadd.f32 %v1226_v33, %v374_v1  ;;  %v840_v40 = vadd.f32 %v1244_v34, %v676_v3 }
 0x110   : > { %v543_v43 = vpop.f32.mrf.mxu0  ;;  %v844_v44 = vpop.f32.mrf.mxu1  ;;  %v512_v34 = vadd.f32 %v1812_v20, %v1832_v38  ;;  %v1975_v38 = vld [vmem:[#allocation7_spill] sm:$0xff] }
 0x111   : > { %v572_v51 = vmax.f32 %v552_v41, 0.0  ;;  %v873_v52 = vmax.f32 %v853_v42, 0.0  ;;  %v544_v53 = vadd.f32 %v543_v43, %v379_v62  ;;  %v845_v54 = vadd.f32 %v844_v44, %v681_v0  ;;  %v329_v0 = vpop.permute.xlu0 %328 }
 0x112   : > { %v1230_v46 = vpop.f32.mrf.mxu0  ;;  %v1248_v47 = vpop.f32.mrf.mxu1  ;;  %v569_v42 = vmax.f32 %v539_v39, 0.0  ;;  %v870_v43 = vmax.f32 %v840_v40, 0.0  ;;  %v507_v44 = vadd.f32 %v1796_v12, %v334_v13 }
 0x113   : > { %v555_v49 = vadd.f32 %v1230_v46, %v394_v60  ;;  %v856_v50 = vadd.f32 %v1248_v47, %v696_v59  ;;  %v536_v60 = vadd.f32 %v1225_v28, %v1778_v2  ;;  %v837_v59 = vadd.f32 %v1243_v29, %v1780_v4 }
 0x114   : > { %v546_v55 = vpop.f32.mrf.mxu0  ;;  %v847_v56 = vpop.f32.mrf.mxu1  ;;  %v570_v41 = vmax.f32 %v544_v53, 0.0  ;;  %v871_v62 = vmax.f32 %v845_v54, 0.0  ;;  %v528_v4 = vadd.f32 %v527_v31, %v1784_v6  ;;  %v824_v28 = vadd.f32 %v1820_v24, %v1826_v27  ;;  %v1977_v54 = vld [vmem:[#allocation12_spill] sm:$0xff] }
 0x115   : > { %v573_v10 = vmax.f32 %v555_v49, 0.0  ;;  %v874_v9 = vmax.f32 %v856_v50, 0.0  ;;  %v547_v58 = vadd.f32 %v546_v55, %v384_v61  ;;  %v848_v57 = vadd.f32 %v847_v56, %v686_v63  ;;  %v631_v6 = vpop.permute.xlu0 %630  ;;  %v1974_v49 = vld [vmem:[#allocation6_spill] sm:$0xff] }
 0x116   : > { %v1972_v61 = vmov 0.0   ;;  %v531_v56 = vadd.f32 %v530_v36, %v1782_v5  ;;  %v832_v63 = vadd.f32 %v831_v37, %v1794_v11  ;;  %v568_v2 = vmax.f32 %v536_v60, 0.0 }
 0x117   : > { %v583_v16 = vpack.c.bf16 %v573_v10, %v572_v51  ;;  %v885_v15 = vpack.c.bf16 %v874_v9, %v873_v52  ;;  %v571_v8 = vmax.f32 %v547_v58, 0.0  ;;  %v872_v7 = vmax.f32 %v848_v57, 0.0  ;;  %v1976_v52 = vld [vmem:[#allocation11_spill] sm:$0xff] }
 0x118   : > { %v869_v9 = vmax.f32 %v837_v59, 0.0  ;;  %v829_v10 = vadd.f32 %v828_v32, %v1800_v14  ;;  %v581_v5 = vpack.c.bf16 %v569_v42, %v568_v2  ;;  %v868_v11 = vmax.f32 %v832_v63, 0.0  ;;  %v1978_v59 = vld [vmem:[#allocation8_spill] sm:$0xff] }
 0x119   : > { %1250 = vmatpush3.bf16.msra.mxu0 %v885_v15  ;;  %1270 = vmatpush3.bf16.msra.mxu1 %v583_v16  ;;  %v582_v1 = vpack.c.bf16 %v571_v8, %v570_v41  ;;  %v884_v3 = vpack.c.bf16 %v872_v7, %v871_v62  ;;  %v636_v15 = vpop.permute.xlu1 %635  ;;  %v523_v16 = vadd.f32 %v1818_v23, %v1810_v19  ;;  %v567_v8 = vmax.f32 %v531_v56, 0.0  ;;  %v319_v37 = vpop.permute.xlu0 %318  ;;  %v1979_v62 = vld [vmem:[#allocation9_spill] sm:$0xff] }
 0x11a   : > { %1251 = vmatprep.subr.bf16.mxu0 %v1972_v61  ;;  %1271 = vmatprep.subr.bf16.mxu1 %v1972_v61  ;;  %v883_v7 = vpack.c.bf16 %v870_v43, %v869_v9  ;;  %v520_v14 = vadd.f32 %v1806_v17, %v1816_v22  ;;  %v821_v29 = vadd.f32 %v1808_v18, %v1828_v30  ;;  %v566_v31 = vmax.f32 %v528_v4, 0.0  ;;  %v1384_v4 = vld [vmem:[%s1954_s3 + $0x8] sm:$0xff]  }
 0x11b   : > { %v867_v19 = vmax.f32 %v829_v10, 0.0  ;;  %v565_v23 = vmax.f32 %v523_v16, 0.0  ;;  %v866_v24 = vmax.f32 %v824_v28, 0.0  ;;  %v515_v27 = vadd.f32 %v1822_v25, %v1830_v35  ;;  %v1973_v25 = vld [vmem:[#allocation10_spill] sm:$0xff] }
 0x11c   : > { %v816_v32 = vadd.f32 %v1824_v26, %v1834_v45  ;;  %v580_v17 = vpack.c.bf16 %v567_v8, %v566_v31  ;;  %v564_v18 = vmax.f32 %v520_v14, 0.0  ;;  %v865_v30 = vmax.f32 %v821_v29, 0.0  ;;  %v1385_v10 = vld [vmem:[%s1954_s3] sm:$0xff]  }
 0x11d   : > { %1252 = vmatpush3.bf16.msra.mxu0 %v884_v3  ;;  %1272 = vmatpush3.bf16.msra.mxu1 %v582_v1  ;;  %v882_v22 = vpack.c.bf16 %v868_v11, %v867_v19  ;;  %v324_v33 = vpop.permute.xlu1 %323  ;;  %v813_v36 = vadd.f32 %v1814_v21, %v1836_v48  ;;  %v808_v35 = vadd.f32 %v1973_v25, %v636_v15  ;;  %v563_v46 = vmax.f32 %v515_v27, 0.0  ;;  %v621_v39 = vpop.permute.xlu0 %620 }
 0x11e   : > { %1253 = vmatprep.subr.bf16.mxu0 %v1972_v61  ;;  %1273 = vmatprep.subr.bf16.mxu1 %v1972_v61  ;;  %v579_v26 = vpack.c.bf16 %v565_v23, %v564_v18  ;;  %v881_v45 = vpack.c.bf16 %v866_v24, %v865_v30  ;;  %v864_v47 = vmax.f32 %v816_v32, 0.0  ;;  %v504_v20 = vadd.f32 %v1974_v49, %v329_v0 }
 0x11f   : > { %v805_v50 = vadd.f32 %v1975_v38, %v631_v6  ;;  %v562_v21 = vmax.f32 %v512_v34, 0.0  ;;  %v863_v48 = vmax.f32 %v813_v36, 0.0  ;;  %v561_v12 = vmax.f32 %v507_v44, 0.0 }
 0x120   : > { %v862_v13 = vmax.f32 %v808_v35, 0.0  ;;  %v499_v53 = vadd.f32 %v1976_v52, %v324_v33  ;;  %v560_v40 = vmax.f32 %v504_v20, 0.0  ;;  %v496_v41 = vadd.f32 %v1978_v59, %v319_v37 }
 0x121   : > { %1254 = vmatpush3.bf16.msra.mxu0 %v883_v7  ;;  %1274 = vmatpush3.bf16.msra.mxu1 %v581_v5  ;;  %v626_v51 = vpop.permute.xlu1 %625  ;;  %v578_v58 = vpack.c.bf16 %v563_v46, %v562_v21  ;;  %v880_v57 = vpack.c.bf16 %v864_v47, %v863_v48  ;;  %v861_v60 = vmax.f32 %v805_v50, 0.0  ;;  %v797_v0 = vadd.f32 %v1979_v62, %v621_v39  ;;  %v985_v28 = vpop.permute.xlu0 %984 }
 0x122   : > { %1255 = vmatprep.subr.bf16.mxu0 %v1972_v61  ;;  %1275 = vmatprep.subr.bf16.mxu1 %v1972_v61  ;;  %v800_v55 = vadd.f32 %v1977_v54, %v626_v51  ;;  %v577_v42 = vpack.c.bf16 %v561_v12, %v560_v40  ;;  %v559_v56 = vmax.f32 %v499_v53, 0.0  ;;  %v558_v1 = vmax.f32 %v496_v41, 0.0 }
 0x123   : > { %v879_v43 = vpack.c.bf16 %v862_v13, %v861_v60  ;;  %v859_v3 = vmax.f32 %v797_v0, 0.0 }
 0x124   : > { %v860_v63 = vmax.f32 %v800_v55, 0.0  ;;  %v576_v2 = vpack.c.bf16 %v559_v56, %v558_v1 }
 0x125   : > { %1256 = vmatpush3.bf16.msra.mxu0 %v882_v22  ;;  %1276 = vmatpush3.bf16.msra.mxu1 %v580_v17  ;;  %v990_v14 = vpop.permute.xlu1 %989 }
 0x126   : > { %1257 = vmatprep.subr.bf16.mxu0 %v1972_v61  ;;  %1277 = vmatprep.subr.bf16.mxu1 %v1972_v61  ;;  %v878_v9 = vpack.c.bf16 %v860_v63, %v859_v3 }
 0x129   : > { %1258 = vmatpush3.bf16.msra.mxu0 %v881_v45  ;;  %1278 = vmatpush3.bf16.msra.mxu1 %v579_v26 }
 0x12a   : > { %1259 = vmatprep.subr.bf16.mxu0 %v1972_v61  ;;  %1279 = vmatprep.subr.bf16.mxu1 %v1972_v61 }
 0x12d   : > { %1260 = vmatpush3.bf16.msra.mxu0 %v880_v57  ;;  %1280 = vmatpush3.bf16.msra.mxu1 %v578_v58 }
 0x12e   : > { %1261 = vmatprep.subr.bf16.mxu0 %v1972_v61  ;;  %1281 = vmatprep.subr.bf16.mxu1 %v1972_v61 }
 0x131   : > { %1262 = vmatpush3.bf16.msra.mxu0 %v879_v43  ;;  %1282 = vmatpush3.bf16.msra.mxu1 %v577_v42 }
 0x132   : > { %1263 = vmatprep.subr.bf16.mxu0 %v1972_v61  ;;  %1283 = vmatprep.subr.bf16.mxu1 %v1972_v61 }
 0x135   : > { %1264 = vmatpush3.bf16.msra.mxu0 %v878_v9  ;;  %1284 = vmatpush3.bf16.msra.mxu1 %v576_v2 }
 0x138   : > { %1266 = vmatmul.mubr.bf16.vlgmr.msra.gmra.mxu0 %v1384_v4  ;;  %1286 = vmatmul.mubr.bf16.vlgmr.msra.gmra.mxu1 %v1385_v10 }
 0x1f8   : > { %v926_v15 = vpop.f32.mrf.mxu0  ;;  %v973_v16 = vpop.f32.mrf.mxu1 }
 0x1f9   : > { %v974_v61 = vadd.f32 %v973_v16, %v926_v15 }
 0x1fa   : > { %v1267_v5 = vpop.f32.mrf.mxu0  ;;  %v1287_v7 = vpop.f32.mrf.mxu1 }
 0x1fb   : > { %v992_v8 = vadd.f32 %v985_v28, %v974_v61 }
 0x1fc   : > { %v929_v11 = vpop.f32.mrf.mxu0  ;;  %v976_v6 = vpop.f32.mrf.mxu1 }
 0x1fd   : > { %994 = vst [vmem:[%s279_s15] sm:$0xff] %v992_v8  ;;  %v977_v29 = vadd.f32 %v976_v6, %v929_v11 }
 0x1fe   : > { %v1268_v31 = vpop.f32.mrf.mxu0  ;;  %v1288_v19 = vpop.f32.mrf.mxu1 }
 0x1ff   : > { %v993_v23 = vadd.f32 %v990_v14, %v977_v29 }
 0x201   : > { %995 = vst [vmem:[%s279_s15 + $0x8] sm:$0xff] %v993_v23 }
 0x202   : > { %1399 = shalt.err (!%p1396_p7)
}
 0x203   : > { %s1400_s10 = scalar_lea.hbm %s1896_s13, 256  ;;  %s1404_s15 = scalar_lea.hbm %s1956_s5, 1024 }
 0x204   : > { %p1401_p10 = scmp.ne.s32.totalorder %s1896_s13, %s1400_s10  ;;  %p1405_p13 = scmp.lt.s32.totalorder %s1896_s13, %s1956_s5 }
 0x205   : > { %p1406_p0 = scmp.lt.s32.totalorder %s1404_s15, %s1400_s10 }
 0x206   : > { %p1402_p11 = pnand %p1401_p10, %p1577_p8 }
 0x207   : > { %p1407_p1 = por %p1406_p0, %p1405_p13 }
 0x208   : > { %p1403_p12 = pneg %p1402_p11 }
 0x20a   : > { %p1408_p2 = pnand %p1407_p1, %p1403_p12 }
 0x20c   : > { %1411 = shalt.err (!%p1408_p2)
}
 0x20d   : > { %s1484_s22 = smov 128   ;;  %s1485_s6 = smov 256  }
 0x20e   : > { %s1486_s26 = smov 8  }
 0x20f   : > { %1289 = dma.vmem_to_hbm [thread:$0]  (%p1577_p8), %s1891_s16, 256, %s1896_s13, %s1900_s17, %s1484_s22, %s1485_s6, %s1486_s26  }
 0x210 PF: > { %p1295_p3 = scmp.ge.s32.totalorder %s1478_s25, 2  ;;  %s1026_s27 = sand.u32 1, %s1450_s18  }
 0x211   : > { %s1027_s30 = scalar_lea.sflag [#allocation4], %s1026_s27 }
 0x212   : > { %p1292_p4 = pnand %p1295_p3, %p1581_p9 }
 0x214   : > { %p1293_p5 = pneg %p1292_p4 }
 0x216   : > { %1445 = dma.done.wait (%p1293_p5), %s1027_s30, 256  }
 0x217   : > { %1447 = vsyncadd (%p1293_p5), %s1027_s30, 4294967040  ;;  %s18_s25 = sadd.s32 1, %s1478_s25   ;;  %s1981_s18 = smov %s1454_s19 }
 0x218   : > { %p15_p6 = scmp.ge.s32.totalorder %s18_s25, 6   ;;  %s1982_s19 = smov %s1458_s20 }
 0x219   : > { %s1983_s20 = smov %s1589_s12  ;;  %s1984_s21 = smov %s1470_s23 }
 0x21a   : > { %s1985_s22 = smov %s1474_s24  ;;  %s1986_s23 = smov %s1989_s28 }
 0x21b   : > { %s1987_s24 = smov %s1993_s29  ;;  %17 = sbr.rel (!%p15_p6) target bundleno = 7 (0x7), region = 121 }
 0x220   :  { %1032 = vsyncpa [#allocation4], 1 }
 0x221   :  { %1034 = vsyncpa [#allocation4 + $0x1], 1 }

</bundles_post_ra>
